<compile_context>
chip_gen: v6e
topology: v6e:2x2x1
jax: 0.10.0
libtpu: 0.0.40
codegen_flags: <defaults>
</compile_context>

<pallas_src>
import functools

import jax
import jax.numpy as jnp
from jax.experimental import pallas as pl
from jax.experimental.pallas import tpu as pltpu


# Only bother single-buffering grid-constant operands once their
# double-buffered footprint is big enough to matter.
_SINGLE_BUFFER_MIN_BYTES = 4 * 1024 * 1024


def _round_up(n, mult):
    return (n + mult - 1) // mult * mult


def _tpu_target():
    """Return (is_v5e, usable_vmem_bytes) for the local TPU, with safe fallbacks."""
    kind = ""
    try:
        kind = (jax.devices()[0].device_kind or "").lower()
    except Exception:
        pass
    vmem_cap = None
    try:
        info = pltpu.get_tpu_info()
        vmem_cap = int(getattr(info, "vmem_capacity_bytes", 0)) or None
    except Exception:
        vmem_cap = None
    if vmem_cap is None:
        vmem_cap = 64 * 1024 * 1024                 # conservative: v7x per-core VMEM
    is_v5e = ("v5e" in kind) or ("v5 lite" in kind) or ("v5lite" in kind)
    usable = min(vmem_cap * 7 // 8, 100 * 1024 * 1024)
    return is_v5e, usable


def _pick_tile(s, base):
    """Largest convenient sequence tile that divides s (<= base)."""
    if s <= base:
        return s
    for t in (base, base // 2, base // 4, 64, 32, 16, 8):
        if t >= 8 and s % t == 0:
            return t
    return s  # indivisible sequence: fall back to one full-sequence tile


def _vmem_limit_or_die(est_bytes, cap_bytes, what):
    """Fail loudly if the estimate exceeds the per-generation budget."""
    if est_bytes > cap_bytes:
        raise ValueError(
            f"{what}: estimated VMEM footprint {est_bytes / 2**20:.1f} MiB exceeds "
            f"the usable per-core budget {cap_bytes / 2**20:.1f} MiB on this TPU; "
            "reduce q_tile / kv_tile / proj_tile.")
    return int(min(cap_bytes, max(est_bytes, 32 * 1024 * 1024)))


def _grid_const_spec(shape, index_map, double_buffered_bytes):
    """BlockSpec for an operand whose block never changes across the grid.

    Large operands (weights) are requested single-buffered so they are resident
    once instead of twice in VMEM; small operands keep the default pipeline
    configuration (also keeps the tiny-shape test on the default, well-tested
    path).  Returns (spec, buffer_count) so the VMEM estimate matches reality.
    """
    if double_buffered_bytes >= _SINGLE_BUFFER_MIN_BYTES:
        try:
            return pl.BlockSpec(shape, index_map, pipeline_mode=pl.Buffered(1)), 1
        except Exception:
            pass  # older JAX without pipeline_mode: fall back to the default
    return pl.BlockSpec(shape, index_map), 2


# -----------------------------------------------------------------------------
# Kernel 1: QKV projection, written head-major, Q pre-scaled by 1/sqrt(head_dim)
# -----------------------------------------------------------------------------
def _qkv_proj_kernel(n_heads, head_dim, q_scale,
                     x_ref, wq_ref, bq_ref, wk_ref, bk_ref, wv_ref, bv_ref,
                     q_ref, k_ref, v_ref):
    """One grid step == (batch b, seq-tile si).

    x_ref     : (1, ts, e)          input rows
    w*_ref    : (e, e)      bf16    (in, out) layout (pre-transposed from torch)
    b*_ref    : (1, e)      f32
    q/k/v_ref : (1, h, ts, hd) bf16 head-major outputs; Q carries the
                1/sqrt(hd) scale so the attention kernel never rescales scores.
    """
    xb = x_ref[0].astype(jnp.bfloat16)                           # (ts, e)

    def project(w_ref, b_ref, out_ref, scale):
        # The (ts, e) f32 intermediate lives only within this call: each of the
        # three projections is produced, biased, cast and stored before the
        # next one starts (small live range, no fused (ts, 3e) f32 spill).
        y = jnp.dot(xb, w_ref[...], preferred_element_type=jnp.float32)
        y = y + b_ref[...]
        if scale != 1.0:
            y = y * scale
        y = y.astype(out_ref.dtype)                              # (ts, e) bf16
        # Head-major store: one (ts, hd) slab per head.  Amortized once per
        # token; keeps the attention hot loop free of per-head lane slicing.
        for h in range(n_heads):
            out_ref[0, h] = y[:, h * head_dim:(h + 1) * head_dim]

    project(wq_ref, bq_ref, q_ref, q_scale)
    project(wk_ref, bk_ref, k_ref, 1.0)
    project(wv_ref, bv_ref, v_ref, 1.0)


# -----------------------------------------------------------------------------
# Kernel 2: flash attention on head-major blocks
# -----------------------------------------------------------------------------
def _flash_attention_kernel(n_heads, head_dim, approx_recip,
                            q_ref, k_ref, v_ref, o_ref, m_scr, l_scr, acc_scr):
    """One grid step == (batch b, q-tile qi, kv-tile ki); ki is the reduction axis.

    q_ref   : (1, h, tq, hd) bf16 (already scaled by 1/sqrt(hd))
    k_ref   : (1, h, tk, hd) bf16
    v_ref   : (1, h, tk, hd) bf16
    o_ref   : (1, tq, e)           heads re-concatenated along embedding
    m_scr   : (h, tq, 1) f32       running row max
    l_scr   : (h, tq, 1) f32       running softmax denominator
    acc_scr : (h, tq, hd) f32      running (unnormalized) output
    """
    ki = pl.program_id(2)

    @pl.when(ki == 0)
    def _init():
        m_scr[...] = jnp.full(m_scr.shape, -jnp.inf, m_scr.dtype)
        l_scr[...] = jnp.zeros(l_scr.shape, l_scr.dtype)
        acc_scr[...] = jnp.zeros(acc_scr.shape, acc_scr.dtype)

    q = q_ref[0]                                                 # (h, tq, hd)
    k = k_ref[0]                                                 # (h, tk, hd)
    v = v_ref[0]                                                 # (h, tk, hd)

    # Per-head Q @ K^T as one batched matmul over the leading head axis
    # (no Python head loop, no explicit K transpose).
    scores = jnp.einsum("hqd,hkd->hqk", q, k,
                        preferred_element_type=jnp.float32)      # (h, tq, tk) f32

    # Online softmax update — all softmax math stays f32 (v5e has no bf16 EUP).
    # Note: (h, tq, 1) stats pad the lane dim to 128; for this module's small
    # head counts that is far cheaper than the per-step relayout a lane-packed
    # (h, tq) layout would require.
    m_prev = m_scr[...]
    m_new = jnp.maximum(m_prev, jnp.max(scores, axis=-1, keepdims=True))
    alpha = jnp.exp(m_prev - m_new)
    p = jnp.exp(scores - m_new)                                  # (h, tq, tk) f32

    l_scr[...] = alpha * l_scr[...] + jnp.sum(p, axis=-1, keepdims=True)
    pv = jnp.einsum("hqk,hkd->hqd", p.astype(v.dtype), v,
                    preferred_element_type=jnp.float32)          # (h, tq, hd) f32
    acc_scr[...] = alpha * acc_scr[...] + pv
    m_scr[...] = m_new

    @pl.when(ki == pl.num_programs(2) - 1)
    def _finalize():
        if approx_recip:
            inv_l = pl.reciprocal(l_scr[...], approx=True)       # EUP slot (~1e-3 rel)
        else:
            inv_l = 1.0 / l_scr[...]
        out = acc_scr[...] * inv_l                               # (h, tq, hd) f32
        # Concatenate heads back along the embedding axis of the (tq, e) output
        # block.  Per-head lane-sliced stores happen only once per q-tile.
        for h in range(n_heads):
            lo = h * head_dim
            o_ref[0, :, lo:lo + head_dim] = out[h].astype(o_ref.dtype)


# -----------------------------------------------------------------------------
# Wrapper
# -----------------------------------------------------------------------------
def self_attention(x, wq, bq, wk, bk, wv, bv, *, n_heads,
                   q_tile=None, kv_tile=None, proj_tile=None,
                   approx_reciprocal=True):
    """Multi-head self-attention matching the PyTorch module's forward.

    x: (m, s, e); w*: (e, e) torch.nn.Linear layout (out, in); b*: (e,).
    approx_reciprocal: use the EUP approximate reciprocal for the softmax
      normalization (~1e-3 relative error); set False for exact parity tests.
    """
    m, s, e = x.shape
    assert e % n_heads == 0, "embed_dim must be divisible by n_heads"
    hd = e // n_heads
    scale = 1.0 / float(hd) ** 0.5

    is_v5e, vmem_cap = _tpu_target()
    base = 128 if is_v5e else 256           # v5e: 4x128 MXU; v6e/v7x: 256-deep MXU
    tq = q_tile if q_tile is not None else _pick_tile(s, base)
    tk = kv_tile if kv_tile is not None else _pick_tile(s, base)
    ts = proj_tile if proj_tile is not None else _pick_tile(s, base)
    for name, t in (("q_tile", tq), ("kv_tile", tk), ("proj_tile", ts)):
        assert s % t == 0, f"sequence length {s} must be divisible by {name}={t}"
        assert t == s or t % 8 == 0, f"{name}={t} must be a multiple of 8 (or == seq)"

    # torch Linear computes x @ W.T + b: pre-transpose once and cast the weights
    # to bf16 (MXU operand dtype); biases stay f32.
    wq_t = wq.T.astype(jnp.bfloat16)
    wk_t = wk.T.astype(jnp.bfloat16)
    wv_t = wv.T.astype(jnp.bfloat16)
    bq2 = bq.reshape(1, e).astype(jnp.float32)
    bk2 = bk.reshape(1, e).astype(jnp.float32)
    bv2 = bv.reshape(1, e).astype(jnp.float32)

    xbytes = x.dtype.itemsize
    e_pad = _round_up(e, 128)
    hd_pad = _round_up(hd, 128)

    # ------------------------- kernel 1: QKV projection ----------------------
    w_spec, w_buf = _grid_const_spec((e, e), lambda b, si: (0, 0), 2 * e * e_pad * 2)
    b_spec, b_buf = _grid_const_spec((1, e), lambda b, si: (0, 0), 2 * 8 * e_pad * 4)

    proj_est = (
        2 * _round_up(ts, 8) * e_pad * xbytes                         # x block (double-buffered)
        + 3 * w_buf * e * e_pad * 2                                   # weights (bf16)
        + 3 * b_buf * 8 * e_pad * 4                                   # biases (padded)
        + 3 * 2 * n_heads * _round_up(ts, 8) * hd_pad * 2             # q/k/v output blocks
        + 2 * _round_up(ts, 8) * e_pad * 4                            # in-kernel f32 projection temp
    )
    proj_vmem = _vmem_limit_or_die(int(proj_est * 1.25), vmem_cap, "qkv projection kernel")

    q_hm, k_hm, v_hm = pl.pallas_call(
        functools.partial(_qkv_proj_kernel, n_heads, hd, scale),
        out_shape=[jax.ShapeDtypeStruct((m, n_heads, s, hd), jnp.bfloat16)] * 3,
        grid_spec=pltpu.PrefetchScalarGridSpec(
            num_scalar_prefetch=0,
            grid=(m, s // ts),
            in_specs=[
                pl.BlockSpec((1, ts, e), lambda b, si: (b, si, 0)),   # x rows
                w_spec, b_spec,                                       # Wq, bq
                w_spec, b_spec,                                       # Wk, bk
                w_spec, b_spec,                                       # Wv, bv
            ],
            out_specs=[pl.BlockSpec((1, n_heads, ts, hd),
                                    lambda b, si: (b, 0, si, 0))] * 3,
        ),
        compiler_params=pltpu.CompilerParams(
            dimension_semantics=("parallel", "parallel"),
            vmem_limit_bytes=proj_vmem),
    )(x, wq_t, bq2, wk_t, bk2, wv_t, bv2)

    # ------------------------- kernel 2: flash attention ---------------------
    attn_est = (
        2 * n_heads * _round_up(tq, 8) * hd_pad * 2                   # Q block
        + 2 * 2 * n_heads * _round_up(tk, 8) * hd_pad * 2             # K and V blocks
        + 2 * _round_up(tq, 8) * e_pad * xbytes                       # output block
        + 2 * n_heads * _round_up(tq, 8) * 128 * 4                    # m/l stats (lane-padded)
        + n_heads * _round_up(tq, 8) * hd_pad * 4                     # acc scratch
        + 3 * n_heads * _round_up(tq, 8) * _round_up(tk, 128) * 4     # scores/p/alpha temps
    )
    attn_vmem = _vmem_limit_or_die(int(attn_est * 1.25), vmem_cap, "flash attention kernel")

    # NOTE(v7x): batch * (s // tq) is the "parallel" extent split across the two
    # TensorCores; keep it >= 2 (and even) for full utilization at batch=1.
    return pl.pallas_call(
        functools.partial(_flash_attention_kernel, n_heads, hd, approx_reciprocal),
        out_shape=jax.ShapeDtypeStruct((m, s, e), x.dtype),
        grid_spec=pltpu.PrefetchScalarGridSpec(
            num_scalar_prefetch=0,
            grid=(m, s // tq, s // tk),
            in_specs=[
                pl.BlockSpec((1, n_heads, tq, hd), lambda b, qi, ki: (b, 0, qi, 0)),
                pl.BlockSpec((1, n_heads, tk, hd), lambda b, qi, ki: (b, 0, ki, 0)),
                pl.BlockSpec((1, n_heads, tk, hd), lambda b, qi, ki: (b, 0, ki, 0)),
            ],
            out_specs=pl.BlockSpec((1, tq, e), lambda b, qi, ki: (b, qi, 0)),
            scratch_shapes=[
                pltpu.VMEM((n_heads, tq, 1), jnp.float32),   # running max
                pltpu.VMEM((n_heads, tq, 1), jnp.float32),   # running denom
                pltpu.VMEM((n_heads, tq, hd), jnp.float32),  # output accumulator
            ]),
        compiler_params=pltpu.CompilerParams(
            dimension_semantics=("parallel", "parallel", "arbitrary"),
            vmem_limit_bytes=attn_vmem),
    )(q_hm, k_hm, v_hm)


# -----------------------------------------------------------------------------
# References
# -----------------------------------------------------------------------------
def _reference_f32(x, wq, bq, wk, bk, wv, bv, *, n_heads):
    """Pure-JAX f32 reference mirroring the PyTorch forward exactly."""
    m, s, e = x.shape
    hd = e // n_heads
    q = (x @ wq.T + bq).reshape(m, s, n_heads, hd).transpose(0, 2, 1, 3)
    k = (x @ wk.T + bk).reshape(m, s, n_heads, hd).transpose(0, 2, 1, 3)
    v = (x @ wv.T + bv).reshape(m, s, n_heads, hd).transpose(0, 2, 1, 3)
    att = jnp.einsum("mhqd,mhkd->mhqk", q, k) / float(hd) ** 0.5
    att = jax.nn.softmax(att, axis=-1)
    out = jnp.einsum("mhqk,mhkd->mhqd", att, v)
    return out.transpose(0, 2, 1, 3).reshape(m, s, e)


def _reference_mixed(x, wq, bq, wk, bk, wv, bv, *, n_heads):
    """Reference using the same bf16-operand / f32-accumulate mix as the kernels."""
    m, s, e = x.shape
    hd = e // n_heads
    scale = 1.0 / float(hd) ** 0.5
    xb = x.astype(jnp.bfloat16)

    def proj(w, b, sc):
        y = jnp.dot(xb, w.T.astype(jnp.bfloat16),
                    preferred_element_type=jnp.float32) + b
        if sc != 1.0:
            y = y * sc
        return y.astype(jnp.bfloat16).reshape(m, s, n_heads, hd).transpose(0, 2, 1, 3)

    q = proj(wq, bq, scale)
    k = proj(wk, bk, 1.0)
    v = proj(wv, bv, 1.0)
    att = jnp.einsum("mhqd,mhkd->mhqk", q, k, preferred_element_type=jnp.float32)
    att = jax.nn.softmax(att, axis=-1)
    out = jnp.einsum("mhqk,mhkd->mhqd", att.astype(jnp.bfloat16), v,
                     preferred_element_type=jnp.float32)
    return out.transpose(0, 2, 1, 3).reshape(m, s, e).astype(x.dtype)


if __name__ == "__main__":
    def check(m, s, e, n_heads, **tile_kw):
        key = jax.random.PRNGKey(0)
        kx, kq, kbq, kk, kbk, kvv, kbv = jax.random.split(key, 7)
        x = jax.random.normal(kx, (m, s, e), dtype=jnp.float32)
        # torch.nn.Linear shapes: W = (out, in), b = (out,).
        wq = jax.random.normal(kq, (e, e), dtype=jnp.float32) * 0.1
        bq = jax.random.normal(kbq, (e,), dtype=jnp.float32) * 0.1
        wk = jax.random.normal(kk, (e, e), dtype=jnp.float32) * 0.1
        bk = jax.random.normal(kbk, (e,), dtype=jnp.float32) * 0.1
        wv = jax.random.normal(kvv, (e, e), dtype=jnp.float32) * 0.1
        bv = jax.random.normal(kbv, (e,), dtype=jnp.float32) * 0.1

        out = self_attention(x, wq, bq, wk, bk, wv, bv, n_heads=n_heads, **tile_kw)
        out = jax.block_until_ready(out)
        assert out.shape == (m, s, e)

        ref_mixed = _reference_mixed(x, wq, bq, wk, bk, wv, bv, n_heads=n_heads)
        ref_f32 = _reference_f32(x, wq, bq, wk, bk, wv, bv, n_heads=n_heads)
        assert jnp.allclose(out, ref_mixed, atol=2e-2, rtol=2e-2), \
            f"mismatch vs mixed-precision reference at shape {(m, s, e, n_heads)}"
        assert jnp.allclose(out, ref_f32, atol=1e-1, rtol=1e-1), \
            f"mismatch vs f32 reference at shape {(m, s, e, n_heads)}"

    # Small shapes consistent with the module: batch=2, seq=8, embed=32, heads=4.
    check(2, 8, 32, 4)
    # Multi-tile case: exercises the online-softmax kv loop, q tiling and the
    # head-major layout at head_dim=64.
    check(2, 256, 256, 4, q_tile=128, kv_tile=64)

    print("KERNEL_OK")
</pallas_src>

<mosaic_0001>
module attributes {stable_mosaic.version = 11 : i64} {
  func.func @_qkv_proj_kernel(%arg0: i32, %arg1: i32, %arg2: memref<1x8x32xf32, #tpu.memory_space<vmem>>, %arg3: memref<32x32xbf16, #tpu.memory_space<vmem>>, %arg4: memref<1x32xf32, #tpu.memory_space<vmem>>, %arg5: memref<32x32xbf16, #tpu.memory_space<vmem>>, %arg6: memref<1x32xf32, #tpu.memory_space<vmem>>, %arg7: memref<32x32xbf16, #tpu.memory_space<vmem>>, %arg8: memref<1x32xf32, #tpu.memory_space<vmem>>, %arg9: memref<1x4x8x8xbf16, #tpu.memory_space<vmem>>, %arg10: memref<1x4x8x8xbf16, #tpu.memory_space<vmem>>, %arg11: memref<1x4x8x8xbf16, #tpu.memory_space<vmem>>) attributes {dimension_semantics = [#tpu.dimension_semantics<parallel>, #tpu.dimension_semantics<parallel>], iteration_bounds = array<i64: 2, 1>, scalar_prefetch = 0 : i64, scratch_operands = 0 : i64, tpu.core_type = #tpu.core_type<tc>, window_params = [{transform_indices = @transform_0, window_bounds = array<i64: 1, 8, 32>}, {pipeline_mode = #tpu.pipeline_mode<synchronous>, transform_indices = @transform_1, window_bounds = array<i64: 32, 32>}, {pipeline_mode = #tpu.pipeline_mode<synchronous>, transform_indices = @transform_2, window_bounds = array<i64: 1, 32>}, {pipeline_mode = #tpu.pipeline_mode<synchronous>, transform_indices = @transform_3, window_bounds = array<i64: 32, 32>}, {pipeline_mode = #tpu.pipeline_mode<synchronous>, transform_indices = @transform_4, window_bounds = array<i64: 1, 32>}, {pipeline_mode = #tpu.pipeline_mode<synchronous>, transform_indices = @transform_5, window_bounds = array<i64: 32, 32>}, {pipeline_mode = #tpu.pipeline_mode<synchronous>, transform_indices = @transform_6, window_bounds = array<i64: 1, 32>}, {transform_indices = @transform_7, window_bounds = array<i64: 1, 4, 8, 8>}, {transform_indices = @transform_8, window_bounds = array<i64: 1, 4, 8, 8>}, {transform_indices = @transform_9, window_bounds = array<i64: 1, 4, 8, 8>}]} {
    %c0 = arith.constant 0 : index
    %c0_0 = arith.constant 0 : index
    %c0_1 = arith.constant 0 : index
    %0 = vector.load %arg2[%c0, %c0_0, %c0_1] : memref<1x8x32xf32, #tpu.memory_space<vmem>>, vector<1x8x32xf32>
    %1 = vector.shape_cast %0 : vector<1x8x32xf32> to vector<8x32xf32>
    %2 = arith.truncf %1 : vector<8x32xf32> to vector<8x32xbf16>
    %c0_2 = arith.constant 0 : index
    %c0_3 = arith.constant 0 : index
    %3 = vector.load %arg3[%c0_2, %c0_3] : memref<32x32xbf16, #tpu.memory_space<vmem>>, vector<32x32xbf16>
    %cst = arith.constant dense<0.000000e+00> : vector<8x32xf32>
    %4 = tpu.matmul %2, %3, %cst {dimension_numbers = #tpu.dot_dimension_numbers<[1], [0], [0], [1], [0, 0, 1, 1], [], []>} : vector<8x32xbf16>, vector<32x32xbf16>, vector<8x32xf32> -> vector<8x32xf32>
    %c0_4 = arith.constant 0 : index
    %c0_5 = arith.constant 0 : index
    %5 = vector.load %arg4[%c0_4, %c0_5] : memref<1x32xf32, #tpu.memory_space<vmem>>, vector<1x32xf32>
    %6 = vector.broadcast %5 : vector<1x32xf32> to vector<8x32xf32>
    %7 = arith.addf %4, %6 : vector<8x32xf32>
    %cst_6 = arith.constant 0.353553385 : f32
    %8 = vector.broadcast %cst_6 : f32 to vector<8x32xf32>
    %9 = arith.mulf %7, %8 : vector<8x32xf32>
    %10 = arith.truncf %9 : vector<8x32xf32> to vector<8x32xbf16>
    %11 = vector.extract_strided_slice %10 {offsets = [0, 0], sizes = [8, 8], strides = [1, 1]} : vector<8x32xbf16> to vector<8x8xbf16>
    %c0_7 = arith.constant 0 : index
    %c0_8 = arith.constant 0 : index
    %c0_9 = arith.constant 0 : index
    %c0_10 = arith.constant 0 : index
    %12 = vector.load %arg9[%c0_7, %c0_8, %c0_9, %c0_10] : memref<1x4x8x8xbf16, #tpu.memory_space<vmem>>, vector<1x1x8x8xbf16>
    %13 = vector.shape_cast %12 : vector<1x1x8x8xbf16> to vector<8x8xbf16>
    %14 = vector.shape_cast %11 : vector<8x8xbf16> to vector<1x1x8x8xbf16>
    tpu.vector_store %arg9[%c0_7, %c0_8, %c0_9, %c0_10], %14 {strides = array<i32>} : memref<1x4x8x8xbf16, #tpu.memory_space<vmem>>, vector<1x1x8x8xbf16>,
    %15 = vector.extract_strided_slice %10 {offsets = [0, 8], sizes = [8, 8], strides = [1, 1]} : vector<8x32xbf16> to vector<8x8xbf16>
    %c0_11 = arith.constant 0 : index
    %c1 = arith.constant 1 : index
    %c0_12 = arith.constant 0 : index
    %c0_13 = arith.constant 0 : index
    %16 = vector.load %arg9[%c0_11, %c1, %c0_12, %c0_13] : memref<1x4x8x8xbf16, #tpu.memory_space<vmem>>, vector<1x1x8x8xbf16>
    %17 = vector.shape_cast %16 : vector<1x1x8x8xbf16> to vector<8x8xbf16>
    %18 = vector.shape_cast %15 : vector<8x8xbf16> to vector<1x1x8x8xbf16>
    tpu.vector_store %arg9[%c0_11, %c1, %c0_12, %c0_13], %18 {strides = array<i32>} : memref<1x4x8x8xbf16, #tpu.memory_space<vmem>>, vector<1x1x8x8xbf16>,
    %19 = vector.extract_strided_slice %10 {offsets = [0, 16], sizes = [8, 8], strides = [1, 1]} : vector<8x32xbf16> to vector<8x8xbf16>
    %c0_14 = arith.constant 0 : index
    %c2 = arith.constant 2 : index
    %c0_15 = arith.constant 0 : index
    %c0_16 = arith.constant 0 : index
    %20 = vector.load %arg9[%c0_14, %c2, %c0_15, %c0_16] : memref<1x4x8x8xbf16, #tpu.memory_space<vmem>>, vector<1x1x8x8xbf16>
    %21 = vector.shape_cast %20 : vector<1x1x8x8xbf16> to vector<8x8xbf16>
    %22 = vector.shape_cast %19 : vector<8x8xbf16> to vector<1x1x8x8xbf16>
    tpu.vector_store %arg9[%c0_14, %c2, %c0_15, %c0_16], %22 {strides = array<i32>} : memref<1x4x8x8xbf16, #tpu.memory_space<vmem>>, vector<1x1x8x8xbf16>,
    %23 = vector.extract_strided_slice %10 {offsets = [0, 24], sizes = [8, 8], strides = [1, 1]} : vector<8x32xbf16> to vector<8x8xbf16>
    %c0_17 = arith.constant 0 : index
    %c3 = arith.constant 3 : index
    %c0_18 = arith.constant 0 : index
    %c0_19 = arith.constant 0 : index
    %24 = vector.load %arg9[%c0_17, %c3, %c0_18, %c0_19] : memref<1x4x8x8xbf16, #tpu.memory_space<vmem>>, vector<1x1x8x8xbf16>
    %25 = vector.shape_cast %24 : vector<1x1x8x8xbf16> to vector<8x8xbf16>
    %26 = vector.shape_cast %23 : vector<8x8xbf16> to vector<1x1x8x8xbf16>
    tpu.vector_store %arg9[%c0_17, %c3, %c0_18, %c0_19], %26 {strides = array<i32>} : memref<1x4x8x8xbf16, #tpu.memory_space<vmem>>, vector<1x1x8x8xbf16>,
    %c0_20 = arith.constant 0 : index
    %c0_21 = arith.constant 0 : index
    %27 = vector.load %arg5[%c0_20, %c0_21] : memref<32x32xbf16, #tpu.memory_space<vmem>>, vector<32x32xbf16>
    %cst_22 = arith.constant dense<0.000000e+00> : vector<8x32xf32>
    %28 = tpu.matmul %2, %27, %cst_22 {dimension_numbers = #tpu.dot_dimension_numbers<[1], [0], [0], [1], [0, 0, 1, 1], [], []>} : vector<8x32xbf16>, vector<32x32xbf16>, vector<8x32xf32> -> vector<8x32xf32>
    %c0_23 = arith.constant 0 : index
    %c0_24 = arith.constant 0 : index
    %29 = vector.load %arg6[%c0_23, %c0_24] : memref<1x32xf32, #tpu.memory_space<vmem>>, vector<1x32xf32>
    %30 = vector.broadcast %29 : vector<1x32xf32> to vector<8x32xf32>
    %31 = arith.addf %28, %30 : vector<8x32xf32>
    %32 = arith.truncf %31 : vector<8x32xf32> to vector<8x32xbf16>
    %33 = vector.extract_strided_slice %32 {offsets = [0, 0], sizes = [8, 8], strides = [1, 1]} : vector<8x32xbf16> to vector<8x8xbf16>
    %c0_25 = arith.constant 0 : index
    %c0_26 = arith.constant 0 : index
    %c0_27 = arith.constant 0 : index
    %c0_28 = arith.constant 0 : index
    %34 = vector.load %arg10[%c0_25, %c0_26, %c0_27, %c0_28] : memref<1x4x8x8xbf16, #tpu.memory_space<vmem>>, vector<1x1x8x8xbf16>
    %35 = vector.shape_cast %34 : vector<1x1x8x8xbf16> to vector<8x8xbf16>
    %36 = vector.shape_cast %33 : vector<8x8xbf16> to vector<1x1x8x8xbf16>
    tpu.vector_store %arg10[%c0_25, %c0_26, %c0_27, %c0_28], %36 {strides = array<i32>} : memref<1x4x8x8xbf16, #tpu.memory_space<vmem>>, vector<1x1x8x8xbf16>,
    %37 = vector.extract_strided_slice %32 {offsets = [0, 8], sizes = [8, 8], strides = [1, 1]} : vector<8x32xbf16> to vector<8x8xbf16>
    %c0_29 = arith.constant 0 : index
    %c1_30 = arith.constant 1 : index
    %c0_31 = arith.constant 0 : index
    %c0_32 = arith.constant 0 : index
    %38 = vector.load %arg10[%c0_29, %c1_30, %c0_31, %c0_32] : memref<1x4x8x8xbf16, #tpu.memory_space<vmem>>, vector<1x1x8x8xbf16>
    %39 = vector.shape_cast %38 : vector<1x1x8x8xbf16> to vector<8x8xbf16>
    %40 = vector.shape_cast %37 : vector<8x8xbf16> to vector<1x1x8x8xbf16>
    tpu.vector_store %arg10[%c0_29, %c1_30, %c0_31, %c0_32], %40 {strides = array<i32>} : memref<1x4x8x8xbf16, #tpu.memory_space<vmem>>, vector<1x1x8x8xbf16>,
    %41 = vector.extract_strided_slice %32 {offsets = [0, 16], sizes = [8, 8], strides = [1, 1]} : vector<8x32xbf16> to vector<8x8xbf16>
    %c0_33 = arith.constant 0 : index
    %c2_34 = arith.constant 2 : index
    %c0_35 = arith.constant 0 : index
    %c0_36 = arith.constant 0 : index
    %42 = vector.load %arg10[%c0_33, %c2_34, %c0_35, %c0_36] : memref<1x4x8x8xbf16, #tpu.memory_space<vmem>>, vector<1x1x8x8xbf16>
    %43 = vector.shape_cast %42 : vector<1x1x8x8xbf16> to vector<8x8xbf16>
    %44 = vector.shape_cast %41 : vector<8x8xbf16> to vector<1x1x8x8xbf16>
    tpu.vector_store %arg10[%c0_33, %c2_34, %c0_35, %c0_36], %44 {strides = array<i32>} : memref<1x4x8x8xbf16, #tpu.memory_space<vmem>>, vector<1x1x8x8xbf16>,
    %45 = vector.extract_strided_slice %32 {offsets = [0, 24], sizes = [8, 8], strides = [1, 1]} : vector<8x32xbf16> to vector<8x8xbf16>
    %c0_37 = arith.constant 0 : index
    %c3_38 = arith.constant 3 : index
    %c0_39 = arith.constant 0 : index
    %c0_40 = arith.constant 0 : index
    %46 = vector.load %arg10[%c0_37, %c3_38, %c0_39, %c0_40] : memref<1x4x8x8xbf16, #tpu.memory_space<vmem>>, vector<1x1x8x8xbf16>
    %47 = vector.shape_cast %46 : vector<1x1x8x8xbf16> to vector<8x8xbf16>
    %48 = vector.shape_cast %45 : vector<8x8xbf16> to vector<1x1x8x8xbf16>
    tpu.vector_store %arg10[%c0_37, %c3_38, %c0_39, %c0_40], %48 {strides = array<i32>} : memref<1x4x8x8xbf16, #tpu.memory_space<vmem>>, vector<1x1x8x8xbf16>,
    %c0_41 = arith.constant 0 : index
    %c0_42 = arith.constant 0 : index
    %49 = vector.load %arg7[%c0_41, %c0_42] : memref<32x32xbf16, #tpu.memory_space<vmem>>, vector<32x32xbf16>
    %cst_43 = arith.constant dense<0.000000e+00> : vector<8x32xf32>
    %50 = tpu.matmul %2, %49, %cst_43 {dimension_numbers = #tpu.dot_dimension_numbers<[1], [0], [0], [1], [0, 0, 1, 1], [], []>} : vector<8x32xbf16>, vector<32x32xbf16>, vector<8x32xf32> -> vector<8x32xf32>
    %c0_44 = arith.constant 0 : index
    %c0_45 = arith.constant 0 : index
    %51 = vector.load %arg8[%c0_44, %c0_45] : memref<1x32xf32, #tpu.memory_space<vmem>>, vector<1x32xf32>
    %52 = vector.broadcast %51 : vector<1x32xf32> to vector<8x32xf32>
    %53 = arith.addf %50, %52 : vector<8x32xf32>
    %54 = arith.truncf %53 : vector<8x32xf32> to vector<8x32xbf16>
    %55 = vector.extract_strided_slice %54 {offsets = [0, 0], sizes = [8, 8], strides = [1, 1]} : vector<8x32xbf16> to vector<8x8xbf16>
    %c0_46 = arith.constant 0 : index
    %c0_47 = arith.constant 0 : index
    %c0_48 = arith.constant 0 : index
    %c0_49 = arith.constant 0 : index
    %56 = vector.load %arg11[%c0_46, %c0_47, %c0_48, %c0_49] : memref<1x4x8x8xbf16, #tpu.memory_space<vmem>>, vector<1x1x8x8xbf16>
    %57 = vector.shape_cast %56 : vector<1x1x8x8xbf16> to vector<8x8xbf16>
    %58 = vector.shape_cast %55 : vector<8x8xbf16> to vector<1x1x8x8xbf16>
    tpu.vector_store %arg11[%c0_46, %c0_47, %c0_48, %c0_49], %58 {strides = array<i32>} : memref<1x4x8x8xbf16, #tpu.memory_space<vmem>>, vector<1x1x8x8xbf16>,
    %59 = vector.extract_strided_slice %54 {offsets = [0, 8], sizes = [8, 8], strides = [1, 1]} : vector<8x32xbf16> to vector<8x8xbf16>
    %c0_50 = arith.constant 0 : index
    %c1_51 = arith.constant 1 : index
    %c0_52 = arith.constant 0 : index
    %c0_53 = arith.constant 0 : index
    %60 = vector.load %arg11[%c0_50, %c1_51, %c0_52, %c0_53] : memref<1x4x8x8xbf16, #tpu.memory_space<vmem>>, vector<1x1x8x8xbf16>
    %61 = vector.shape_cast %60 : vector<1x1x8x8xbf16> to vector<8x8xbf16>
    %62 = vector.shape_cast %59 : vector<8x8xbf16> to vector<1x1x8x8xbf16>
    tpu.vector_store %arg11[%c0_50, %c1_51, %c0_52, %c0_53], %62 {strides = array<i32>} : memref<1x4x8x8xbf16, #tpu.memory_space<vmem>>, vector<1x1x8x8xbf16>,
    %63 = vector.extract_strided_slice %54 {offsets = [0, 16], sizes = [8, 8], strides = [1, 1]} : vector<8x32xbf16> to vector<8x8xbf16>
    %c0_54 = arith.constant 0 : index
    %c2_55 = arith.constant 2 : index
    %c0_56 = arith.constant 0 : index
    %c0_57 = arith.constant 0 : index
    %64 = vector.load %arg11[%c0_54, %c2_55, %c0_56, %c0_57] : memref<1x4x8x8xbf16, #tpu.memory_space<vmem>>, vector<1x1x8x8xbf16>
    %65 = vector.shape_cast %64 : vector<1x1x8x8xbf16> to vector<8x8xbf16>
    %66 = vector.shape_cast %63 : vector<8x8xbf16> to vector<1x1x8x8xbf16>
    tpu.vector_store %arg11[%c0_54, %c2_55, %c0_56, %c0_57], %66 {strides = array<i32>} : memref<1x4x8x8xbf16, #tpu.memory_space<vmem>>, vector<1x1x8x8xbf16>,
    %67 = vector.extract_strided_slice %54 {offsets = [0, 24], sizes = [8, 8], strides = [1, 1]} : vector<8x32xbf16> to vector<8x8xbf16>
    %c0_58 = arith.constant 0 : index
    %c3_59 = arith.constant 3 : index
    %c0_60 = arith.constant 0 : index
    %c0_61 = arith.constant 0 : index
    %68 = vector.load %arg11[%c0_58, %c3_59, %c0_60, %c0_61] : memref<1x4x8x8xbf16, #tpu.memory_space<vmem>>, vector<1x1x8x8xbf16>
    %69 = vector.shape_cast %68 : vector<1x1x8x8xbf16> to vector<8x8xbf16>
    %70 = vector.shape_cast %67 : vector<8x8xbf16> to vector<1x1x8x8xbf16>
    tpu.vector_store %arg11[%c0_58, %c3_59, %c0_60, %c0_61], %70 {strides = array<i32>} : memref<1x4x8x8xbf16, #tpu.memory_space<vmem>>, vector<1x1x8x8xbf16>,
    return
  }
  func.func @transform_0(%arg0: i32, %arg1: i32) -> (i32, i32, i32) {
    %c0_i32 = arith.constant 0 : i32
    %c0_i32_0 = arith.constant 0 : i32
    return %arg0, %arg1, %c0_i32 : i32, i32, i32
  }
  func.func @transform_1(%arg0: i32, %arg1: i32) -> (i32, i32) {
    %c0_i32 = arith.constant 0 : i32
    %c0_i32_0 = arith.constant 0 : i32
    %c0_i32_1 = arith.constant 0 : i32
    return %c0_i32, %c0_i32_0 : i32, i32
  }
  func.func @transform_2(%arg0: i32, %arg1: i32) -> (i32, i32) {
    %c0_i32 = arith.constant 0 : i32
    %c0_i32_0 = arith.constant 0 : i32
    %c0_i32_1 = arith.constant 0 : i32
    return %c0_i32, %c0_i32_0 : i32, i32
  }
  func.func @transform_3(%arg0: i32, %arg1: i32) -> (i32, i32) {
    %c0_i32 = arith.constant 0 : i32
    %c0_i32_0 = arith.constant 0 : i32
    %c0_i32_1 = arith.constant 0 : i32
    return %c0_i32, %c0_i32_0 : i32, i32
  }
  func.func @transform_4(%arg0: i32, %arg1: i32) -> (i32, i32) {
    %c0_i32 = arith.constant 0 : i32
    %c0_i32_0 = arith.constant 0 : i32
    %c0_i32_1 = arith.constant 0 : i32
    return %c0_i32, %c0_i32_0 : i32, i32
  }
  func.func @transform_5(%arg0: i32, %arg1: i32) -> (i32, i32) {
    %c0_i32 = arith.constant 0 : i32
    %c0_i32_0 = arith.constant 0 : i32
    %c0_i32_1 = arith.constant 0 : i32
    return %c0_i32, %c0_i32_0 : i32, i32
  }
  func.func @transform_6(%arg0: i32, %arg1: i32) -> (i32, i32) {
    %c0_i32 = arith.constant 0 : i32
    %c0_i32_0 = arith.constant 0 : i32
    %c0_i32_1 = arith.constant 0 : i32
    return %c0_i32, %c0_i32_0 : i32, i32
  }
  func.func @transform_7(%arg0: i32, %arg1: i32) -> (i32, i32, i32, i32) {
    %c0_i32 = arith.constant 0 : i32
    %c0_i32_0 = arith.constant 0 : i32
    %c0_i32_1 = arith.constant 0 : i32
    return %arg0, %c0_i32, %arg1, %c0_i32_0 : i32, i32, i32, i32
  }
  func.func @transform_8(%arg0: i32, %arg1: i32) -> (i32, i32, i32, i32) {
    %c0_i32 = arith.constant 0 : i32
    %c0_i32_0 = arith.constant 0 : i32
    %c0_i32_1 = arith.constant 0 : i32
    return %arg0, %c0_i32, %arg1, %c0_i32_0 : i32, i32, i32, i32
  }
  func.func @transform_9(%arg0: i32, %arg1: i32) -> (i32, i32, i32, i32) {
    %c0_i32 = arith.constant 0 : i32
    %c0_i32_0 = arith.constant 0 : i32
    %c0_i32_1 = arith.constant 0 : i32
    return %arg0, %c0_i32, %arg1, %c0_i32_0 : i32, i32, i32, i32
  }
}

</mosaic_0001>

<bundles_post_ra>
// kernel: tpu_custom_call.1
= control target key start
LH: loop header
LB: loop body
LE: loop exit
PB: predicated region body
PF: predicated region fallthrough
CT: control target
= control target key end

     0   :  { %s1775_s0 = inlined_call_operand.hbm [shape: f32[2,8,32], index: 0, kind: input, shape index: {}]   ;;  %s1776_s1 = inlined_call_operand.hbm [shape: bf16[32,32], index: 1, kind: input, shape index: {}]   ;;  %s1777_s2 = inlined_call_operand.vmem [shape: f32[1,32], index: 2, kind: input, shape index: {}]   ;;  %s1778_s3 = inlined_call_operand.hbm [shape: bf16[32,32], index: 3, kind: input, shape index: {}]   ;;  %s1779_s4 = inlined_call_operand.vmem [shape: f32[1,32], index: 4, kind: input, shape index: {}]   ;;  %s1780_s5 = inlined_call_operand.hbm [shape: bf16[32,32], index: 5, kind: input, shape index: {}]   ;;  %s1781_s6 = inlined_call_operand.vmem [shape: f32[1,32], index: 6, kind: input, shape index: {}]   ;;  %s1782_s7 = inlined_call_operand.hbm [shape: bf16[2,4,8,8], index: 7, kind: output, shape index: {0}]   ;;  %s1783_s8 = inlined_call_operand.hbm [shape: bf16[2,4,8,8], index: 8, kind: output, shape index: {1}]   ;;  %s1784_s9 = inlined_call_operand.hbm [shape: bf16[2,4,8,8], index: 9, kind: output, shape index: {2}]  }
   0x1   :  { %1790 = sst [smem:[#allocation21_spill]] %s1776_s1 }
   0x2   :  { %1791 = sst [smem:[#allocation22_spill]] %s1778_s3 }
   0x3   :  { %1792 = sst [smem:[#allocation23_spill]] %s1780_s5 }
   0x4   :  { %15 = vsyncpa [#allocation3], 0 }
   0x5   :  { %17 = vsyncpa [#allocation3 + $0x1], 0 }
   0x6   :  { %18 = vsyncpa [#allocation6], 0 }
   0x7   :  { %19 = vsyncpa [#allocation9], 0 }
   0x8   :  { %20 = vsyncpa [#allocation4], 0 }
   0x9   :  { %22 = vsyncpa [#allocation4 + $0x1], 0 }
   0xa   :  { %23 = vsyncpa [#allocation12], 0 }
   0xb   :  { %25 = vsyncpa [#allocation12 + $0x1], 0  ;;  %s1453_s30 = smov 0   ;;  %s1455_s10 = smov 0  }
   0xc   :  { %s1457_s11 = smov 0   ;;  %s1459_s12 = smov 0  }
   0xd   :  { %s1461_s13 = smov 0   ;;  %s1463_s14 = smov 0  }
   0xe LB: > { %s1484_s15 = sadd.s32 4294967295, %s1385_s14   ;;  %s1786_s16 = sadd.s32 4294967294, %s1385_s14   ;;  %s1385_s14 = sphi %s1463_s14, %s31_s14   ;;  %s1381_s13 = sphi %s1461_s13, %s1819_s13   ;;  %s1377_s12 = sphi %s1459_s12, %s1818_s12   ;;  %s1373_s11 = sphi %s1457_s11, %s1817_s11   ;;  %s1369_s10 = sphi %s1455_s10, %s1816_s10   ;;  %s1365_s30 = sphi %s1453_s30, %s1815_s30  }
   0xf   : > { %p65_p0 = scmp.ne.s32.totalorder %s1369_s10, %s1365_s30  ;;  %p1785_p1 = scmp.eq.s32.totalorder %s1484_s15, 0 }
  0x10   : > { %p223_p3 = scmp.eq.s32.totalorder %s1786_s16, 1  ;;  %p928_p5 = scmp.ge.s32.totalorder %s1385_s14, 1 }
  0x11   : > { %p1495_p4 = por %p1785_p1, %p65_p0  ;;  %p286_p7 = scmp.lt.s32.totalorder %s1385_s14, 3 }
  0x12   : > { %p1500_p6 = por %p223_p3, %p65_p0  ;;  %s1387_s20 = smov [#allocation5]  }
  0x13   : > { %s1793_s17 = scalar_select %p1495_p4, 1, 0 }
  0x14   : > { %s1794_s18 = scalar_select %p1500_p6, 1, 0 }
  0x15   : > { %p1505_p8 = pnand %p928_p5, %p286_p7  ;;  %s298_s21 = sshll.u32 %s1387_s20, 4  ;;  %s299_s21 = int_to_ptr.vmem [resolvable:$true] %s298_s21 }
  0x16   : > { %1795 = sst [smem:[#allocation19_spill]] %s1794_s18  ;;  %s1388_s23 = smov [#allocation7]  }
  0x17   : > { %p1037_p9 = pneg %p1505_p8  ;;  %s314_s24 = sshll.u32 %s1388_s23, 4  ;;  %s315_s24 = int_to_ptr.vmem [resolvable:$true] %s314_s24 }
  0x18   : > { %s1389_s25 = smov [#allocation8]   ;;  %s1146_s27 = scalar_lea.vmem %s299_s21, 256 }
  0x19   : > { %p1514_p11 = pnand %p1037_p9, %p1785_p1  ;;  %s330_s26 = sshll.u32 %s1389_s25, 4  ;;  %s331_s26 = int_to_ptr.vmem [resolvable:$true] %s330_s26 }
  0x1a   : > { %p1147_p13 = scmp.ne.s32.totalorder %s299_s21, %s1146_s27  ;;  %p1154_p5 = scmp.lt.s32.totalorder %s299_s21, %s299_s21 }
  0x1b   : > { %p1137_p12 = pneg %p1514_p11  ;;  %p1155_p7 = scmp.lt.s32.totalorder %s1146_s27, %s1146_s27 }
  0x1d   : > { %p1149_p0 = pnand %p1147_p13, %p1137_p12  ;;  %p1156_p9 = por %p1155_p7, %p1154_p5 }
  0x1f   : > { %p1150_p3 = pneg %p1149_p0 }
  0x21   : > { %p1157_p10 = pnand %p1156_p9, %p1150_p3 }
  0x23   : > { %1160 = shalt.err (!%p1157_p10)
}
  0x24   : > { %s1390_s28 = smov 64   ;;  %s1391_s29 = smov 4  }
  0x25   : > { %s1798_s1 = sld [smem:[#allocation21_spill]]  ;;  %s1172_s25 = scalar_lea.vmem %s315_s24, 256 }
  0x26   : > { %p1173_p1 = scmp.ne.s32.totalorder %s315_s24, %s1172_s25  ;;  %p1180_p2 = scmp.lt.s32.totalorder %s315_s24, %s315_s24 }
  0x27   : > { %p1181_p6 = scmp.lt.s32.totalorder %s1172_s25, %s1172_s25 }
  0x28   : > { %p1175_p13 = pnand %p1173_p1, %p1137_p12 }
  0x29   : > { %p1182_p5 = por %p1181_p6, %p1180_p2 }
  0x2a   : > { %p1176_p0 = pneg %p1175_p13 }
  0x2b   : > { %1040 = dma.hbm_to_vmem [thread:$0]  (!%p1514_p11), %s1798_s1, 256, %s299_s21, [#allocation6], %s1390_s28, %s1390_s28, %s1391_s29  }
  0x2c   : > { %p1183_p3 = pnand %p1182_p5, %p1176_p0 }
  0x2e   : > { %1186 = shalt.err (!%p1183_p3)
}
  0x2f   : > { %s1799_s3 = sld [smem:[#allocation22_spill]]  ;;  %s1198_s21 = scalar_lea.vmem %s331_s26, 256 }
  0x30   : > { %p1199_p10 = scmp.ne.s32.totalorder %s331_s26, %s1198_s21  ;;  %p1206_p9 = scmp.lt.s32.totalorder %s331_s26, %s331_s26 }
  0x31   : > { %p1207_p13 = scmp.lt.s32.totalorder %s1198_s21, %s1198_s21 }
  0x32   : > { %p1201_p7 = pnand %p1199_p10, %p1137_p12 }
  0x33   : > { %p1208_p4 = por %p1207_p13, %p1206_p9 }
  0x34   : > { %p1202_p1 = pneg %p1201_p7 }
  0x35   : > { %1043 = dma.hbm_to_vmem [thread:$0]  (!%p1514_p11), %s1799_s3, 256, %s315_s24, [#allocation6], %s1390_s28, %s1390_s28, %s1391_s29  }
  0x36   : > { %p1209_p2 = pnand %p1208_p4, %p1202_p1 }
  0x38   : > { %1212 = shalt.err (!%p1209_p2)
}
  0x39   : > { %s1800_s5 = sld [smem:[#allocation23_spill]]  ;;  %s52_s16 = sadd.s32 1, %s1373_s11 }
  0x3a   : > { %s43_s24 = sadd.s32 1, %s1381_s13  ;;  %p59_p4 = scmp.ne.s32.totalorder %s1373_s11, %s1369_s10 }
  0x3b   : > { %p45_p6 = scmp.ge.s32.totalorder %s43_s24, 2  ;;  %p60_p12 = scmp.eq.s32.totalorder %s1385_s14, 0 }
  0x3c   : > { %p1801_p0 = scmp.eq.s32.totalorder %s1484_s15, 1  ;;  %p1064_p3 = scmp.lt.s32.totalorder %s1385_s14, 2 }
  0x3d   : > { %s1821_s24 = smov (%p45_p6, %s43_s24), 0  ;;  %p61_p10 = por %p60_p12, %p59_p4 }
  0x3e   : > { %p1551_p5 = por %p1801_p0, %p59_p4  ;;  %1803 = sst [smem:[#allocation20_spill]] %s1821_s24 }
  0x3f   : > { %1046 = dma.hbm_to_vmem [thread:$0]  (!%p1514_p11), %s1800_s5, 256, %s331_s26, [#allocation9], %s1390_s28, %s1390_s28, %s1391_s29  }
  0x40   : > { %s347_s25 = sand.u32 1, %s1373_s11   ;;  %s47_s27 = ssub.s32 %s1381_s13, %s1821_s24 }
  0x41   : > { %p50_p7 = scmp.eq.s32.totalorder %s47_s27, 0  ;;  %s933_s26 = sshll.u32 %s347_s25, 3 }
  0x42   : > { %s934_s28 = sshll.u32 %s1381_s13, 7  ;;  %s351_s1 = scalar_lea.vmem [#allocation2], %s933_s26 }
  0x43   : > { %s1563_s29 = scalar_select %p50_p7, %s1373_s11, %s52_s16  }
  0x44   : > { %s357_s23 = scalar_lea.hbm %s1775_s0, %s934_s28  ;;  %s359_s3 = sshll.u32 %s351_s1, 4  ;;  %s360_s3 = int_to_ptr.vmem [resolvable:$true] %s359_s3 }
  0x45   : > { %p1570_p11 = pnand %p1064_p3, %p61_p10  ;;  %s348_s18 = scalar_lea.sflag [#allocation3], %s347_s25 }
  0x46   : > { %s1226_s27 = scalar_lea.vmem %s360_s3, 128  ;;  %s1392_s16 = smov [#allocation2]  }
  0x47   : > { %p1215_p1 = pneg %p1570_p11  ;;  %p1227_p9 = scmp.ne.s32.totalorder %s360_s3, %s1226_s27 }
  0x48   : > { %s1231_s24 = sshll.u32 %s1392_s16, 4  ;;  %s1232_s24 = int_to_ptr.vmem [resolvable:$false] %s1231_s24 }
  0x49   : > { %p1229_p13 = pnand %p1227_p9, %p1215_p1  ;;  %s1233_s28 = scalar_lea.vmem %s1232_s24, 256 }
  0x4a   : > { %p1234_p4 = scmp.lt.s32.totalorder %s360_s3, %s1232_s24  ;;  %p1235_p6 = scmp.lt.s32.totalorder %s1233_s28, %s1226_s27 }
  0x4b   : > { %p1230_p2 = pneg %p1229_p13 }
  0x4c   : > { %p1236_p12 = por %p1235_p6, %p1234_p4 }
  0x4e   : > { %p1237_p0 = pnand %p1236_p12, %p1230_p2 }
  0x50   : > { %1240 = shalt.err (!%p1237_p0)
}
  0x51   : > { %1050 = dma.hbm_to_vmem [thread:$0]  (!%p1570_p11), %s357_s23, 128, %s360_s3, %s348_s18  }
  0x52   : > { %368 = sbr.rel (%p1505_p8) target bundleno = 479 (0x1df), region = 48  ;;  %s1581_s1 = sand.u32 (!%p1505_p8), 1, %s1369_s10  }
  0x53   : > { %s936_s25 = sshll.u32 (!%p1505_p8), %s1581_s1, 3  ;;  %s371_s26 = scalar_lea.sflag (!%p1505_p8), [#allocation3], %s1581_s1 }
  0x54   : > { %s374_s21 = scalar_lea.vmem (!%p1505_p8), [#allocation2], %s936_s25  ;;  %p1805_p3 = scmp.ne.s32.totalorder (!%p1505_p8), %s1793_s17, 0 }
  0x57   : > { %1344 = dma.done.wait (%p1805_p3), %s371_s26, 128  }
  0x58   : > { %1346 = vsyncadd (%p1805_p3), %s371_s26, 4294967168  ;;  %p1806_p10 = scmp.eq.s32.totalorder %s1484_s15, 0 }
  0x5a   : > { %1348 = dma.done.wait (%p1806_p10), [#allocation6], 512   ;;  %p1807_p7 = pmov %p1806_p10 }
  0x5c   : > { %1350 = vsyncadd (%p1807_p7), [#allocation6], 4294966784  ;;  %p1808_p8 = pmov %p1807_p7 }
  0x5d   : > { %p1809_p11 = pmov %p1807_p7 }
  0x5e   : > { %1352 = dma.done.wait (%p1808_p8), [#allocation9], 256  }
  0x5f   : > { %1354 = vsyncadd (%p1809_p11), [#allocation9], 4294967040  ;;  %v1393_v0 = vmov 0.0   ;;  %vm1394_vm0 = vmmov 0   ;;  %v1129_v1 = vld [vmem:[#allocation5 + $0x8] sm:$0xff]   ;;  %v1130_v2 = vld [vmem:[#allocation7 + $0x8] sm:$0xff]  }
  0x60   : > { %993 = vmatprep.subr.bf16.mxu0 %v1393_v0  ;;  %1001 = vmatprep.subr.bf16.mxu1 %v1393_v0  ;;  %v1131_v3 = vld [vmem:[#allocation5] sm:$0xff]   ;;  %v1132_v4 = vld [vmem:[#allocation7] sm:$0xff]   ;;  %vm457_vm1 = vcmask 261120   ;;  %v1133_v7 = vld [vmem:[#allocation8 + $0x8] sm:$0xff]   ;;  %s1604_s17 = sshll.u32 %s1581_s1, 4  ;;  %vm503_vm2 = vcmask 60416  }
  0x61   : > { %997 = vmatprep.mubr.msk.bf16.mxu0 %vm1394_vm0, %v1393_v0  ;;  %1005 = vmatprep.mubr.msk.bf16.mxu1 %vm1394_vm0, %v1393_v0  ;;  %v432_v5 = vld [vmem:[%s374_s21] sm:$0xff]  ;;  %v1134_v8 = vld [vmem:[#allocation8] sm:$0xff]   ;;  %s1610_s24 = scalar_lea.vmem [#allocation11], %s1604_s17  ;;  %s1395_s20 = smov 104  }
  0x62   : > { %994 = vmatpush3.bf16.msra.mxu0 %v1129_v1  ;;  %1002 = vmatpush3.bf16.msra.mxu1 %v1130_v2  ;;  %v433_v6 = vpack.c.bf16 %v432_v5, %v432_v5  ;;  %v943_v9 = vld [vmem:[%s1777_s2] ss:$0 sm:$0xff]  ;;  %s1396_s23 = smov 120   ;;  %s1618_s28 = scalar_lea.vmem [#allocation10], %s1604_s17 }
  0x63   : > { %995 = vmatprep.subr.bf16.mxu0 %v1393_v0  ;;  %1003 = vmatprep.subr.bf16.mxu1 %v1393_v0  ;;  %v951_v10 = vld [vmem:[%s1779_s4] ss:$0 sm:$0xff]  ;;  %s1397_s25 = smov 112   ;;  %s1623_s26 = scalar_lea.vmem [#allocation13], %s1604_s17 }
  0x64   : > { %v959_v23 = vld [vmem:[%s1781_s6] ss:$0 sm:$0xff]  ;;  %s731_s21 = sshll.u32 %s1610_s24, 4  ;;  %s694_s3 = sand.u32 1, %s1484_s15   ;;  %s1633_s21 = int_to_ptr.vmem [resolvable:$true] %s731_s21 }
  0x65   : > { %s1630_s5 = sshll.u32 %s1377_s12, 8  ;;  %s714_s17 = sshll.u32 %s1618_s28, 4  ;;  %s1645_s17 = int_to_ptr.vmem [resolvable:$true] %s714_s17 }
  0x66   : > { %996 = vmatpush3.bf16.msra.mxu0 %v1131_v3  ;;  %1004 = vmatpush3.bf16.msra.mxu1 %v1132_v4  ;;  %s1643_s15 = scalar_lea.hbm %s1783_s8, %s1630_s5  ;;  %s1651_s12 = scalar_lea.sflag [#allocation12], %s694_s3 }
  0x67   : > { %1009 = vmatprep.subr.bf16.mxu0 %v1393_v0 }
  0x69   : > { %998 = vmatmul.mubr.msk.bf16.vlgmr.msra.gmra.mxu0 %vm457_vm1, %v433_v6  ;;  %1006 = vmatmul.mubr.msk.bf16.vlgmr.msra.gmra.mxu1 %vm457_vm1, %v433_v6 }
  0x6a   : > { %1010 = vmatpush3.bf16.msra.mxu0 %v1133_v7  ;;  %1013 = vmatprep.mubr.msk.bf16.mxu0 %vm1394_vm0, %v1393_v0 }
  0x6b   : > { %1011 = vmatprep.subr.bf16.mxu0 %v1393_v0 }
  0x6e   : > { %1012 = vmatpush3.bf16.msra.mxu0 %v1134_v8 }
  0x71   : > { %1014 = vmatmul.mubr.msk.bf16.vlgmr.msra.gmra.mxu0 %vm457_vm1, %v433_v6 }
 0x129   : > { %v495_v11 = vpop.f32.mrf.mxu0  ;;  %v580_v13 = vpop.f32.mrf.mxu1 }
 0x12a   : > { %v496_v12 = vadd.f32 %v943_v9, %v495_v11  ;;  %v581_v14 = vadd.f32 %v951_v10, %v580_v13 }
 0x12b   : > { %v999_v15 = vpop.f32.mrf.mxu0  ;;  %v1007_v17 = vpop.f32.mrf.mxu1 }
 0x12c   : > { %v501_v16 = vmul.f32 0.35355338, %v496_v12  ;;  %v586_v18 = vpack.c.bf16 %v581_v14, %v581_v14 }
 0x12d   : > { %v498_v19 = vpop.f32.mrf.mxu0  ;;  %v583_v21 = vpop.f32.mrf.mxu1 }
 0x12e   : > { %v502_v20 = vpack.c.bf16 %v501_v16, %v501_v16  ;;  %587 = vst.msk [vmem:[%s1610_s24] sm:$0xf] %vm503_vm2, %v586_v18  ;;  %601 = vrot.lane.b32.xlu1 %v586_v18, %s1395_s20  ;;  %591 = vrot.lane.b32.xlu0 %v586_v18, %s1396_s23 }
 0x12f   : > { %v1000_v22 = vpop.f32.mrf.mxu0  ;;  %v1008_v24 = vpop.f32.mrf.mxu1 }
 0x130   : > { %504 = vst.msk [vmem:[%s1618_s28] sm:$0xf] %vm503_vm2, %v502_v20 }
 0x131   : > { %v663_v25 = vpop.f32.mrf.mxu0 }
 0x132   : > { %v664_v26 = vadd.f32 %v959_v23, %v663_v25  ;;  %596 = vrot.lane.b32.xlu0 %v586_v18, %s1397_s25  ;;  %508 = vrot.lane.b32.xlu1 %v502_v20, %s1396_s23 }
 0x133   : > { %v1015_v27 = vpop.f32.mrf.mxu0 }
 0x134   : > { %v669_v28 = vpack.c.bf16 %v664_v26, %v664_v26 }
 0x135   : > { %v666_v29 = vpop.f32.mrf.mxu0 }
 0x136   : > { %670 = vst.msk [vmem:[%s1623_s26] sm:$0xf] %vm503_vm2, %v669_v28  ;;  %513 = vrot.lane.b32.xlu0 %v502_v20, %s1397_s25  ;;  %518 = vrot.lane.b32.xlu1 %v502_v20, %s1395_s20 }
 0x137   : > { %v1016_v30 = vpop.f32.mrf.mxu0 }
 0x13a   : > { %679 = vrot.lane.b32.xlu1 %v669_v28, %s1397_s25  ;;  %674 = vrot.lane.b32.xlu0 %v669_v28, %s1396_s23  ;;  %s1398_s23 = smov [#allocation11]  }
 0x13b   : > { %s1245_s27 = sshll.u32 %s1398_s23, 4  ;;  %s1246_s27 = int_to_ptr.vmem [resolvable:$false] %s1245_s27 }
 0x13c   : > { %s1247_s16 = scalar_lea.vmem %s1246_s27, 512  ;;  %p1248_p2 = scmp.lt.s32.totalorder %s1633_s21, %s1246_s27 }
 0x13e   : > { %684 = vrot.lane.b32.xlu0 %v669_v28, %s1395_s20  ;;  %s1241_s20 = scalar_lea.vmem %s1633_s21, 256 }
 0x13f   : > { %p1242_p1 = scmp.ne.s32.totalorder %s1633_s21, %s1241_s20  ;;  %p1249_p4 = scmp.lt.s32.totalorder %s1247_s16, %s1241_s20 }
 0x141   : > { %p1243_p9 = pnand %p1242_p1, %p1551_p5  ;;  %p1250_p6 = por %p1249_p4, %p1248_p2 }
 0x143   : > { %p1244_p13 = pneg %p1243_p9 }
 0x145   : > { %p1251_p12 = pnand %p1250_p6, %p1244_p13 }
 0x1a0   : > { %v602_v31 = vpop.permute.xlu1 %601  ;;  %v592_v32 = vpop.permute.xlu0 %591 }
 0x1a1   : > { %958 = vst.msk [vmem:[%s1610_s24 + $0xc] sm:$0xf] %vm503_vm2, %v602_v31  ;;  %956 = vst.msk [vmem:[%s1610_s24 + $0x4] sm:$0xf] %vm503_vm2, %v592_v32 }
 0x1a4   : > { %v597_v33 = vpop.permute.xlu0 %596  ;;  %v509_v34 = vpop.permute.xlu1 %508 }
 0x1a5   : > { %957 = vst.msk [vmem:[%s1610_s24 + $0x8] sm:$0xf] %vm503_vm2, %v597_v33  ;;  %948 = vst.msk [vmem:[%s1618_s28 + $0x4] sm:$0xf] %vm503_vm2, %v509_v34 }
 0x1a6   : > { %1254 = shalt.err (!%p1251_p12)
}
 0x1a7   : > { %s1255_s24 = scalar_lea.hbm %s1643_s15, 256  ;;  %s1259_s18 = scalar_lea.hbm %s1783_s8, 512 }
 0x1a8   : > { %p1256_p0 = scmp.ne.s32.totalorder %s1643_s15, %s1255_s24  ;;  %p1260_p7 = scmp.lt.s32.totalorder %s1643_s15, %s1783_s8 }
 0x1a9   : > { %p1261_p8 = scmp.lt.s32.totalorder %s1259_s18, %s1255_s24 }
 0x1aa   : > { %p1257_p3 = pnand %p1256_p0, %p1551_p5 }
 0x1ab   : > { %p1262_p11 = por %p1261_p8, %p1260_p7 }
 0x1ac   : > { %p1258_p10 = pneg %p1257_p3 }
 0x1ae   : > { %p1263_p1 = pnand %p1262_p11, %p1258_p10 }
 0x1b0   : > { %1266 = shalt.err (!%p1263_p1)
}
 0x1b1   : > { %s1399_s20 = smov 64   ;;  %s1400_s27 = smov 4   ;;  %v514_v35 = vpop.permute.xlu0 %513  ;;  %v519_v36 = vpop.permute.xlu1 %518 }
 0x1b2   : > { %1032 = dma.vmem_to_hbm [thread:$0]  (%p1551_p5), %s1633_s21, 256, %s1643_s15, %s1651_s12, %s1399_s20, %s1399_s20, %s1400_s27  }
 0x1b3   : > { %s1681_s25 = scalar_lea.hbm %s1782_s7, %s1630_s5  ;;  %949 = vst.msk [vmem:[%s1618_s28 + $0x8] sm:$0xf] %vm503_vm2, %v514_v35  ;;  %950 = vst.msk [vmem:[%s1618_s28 + $0xc] sm:$0xf] %vm503_vm2, %v519_v36  ;;  %s690_s3 = scalar_lea.sflag [#allocation4], %s1581_s1 }
 0x1b4   : > { %s1267_s18 = scalar_lea.vmem %s1645_s17, 256  ;;  %s1401_s19 = smov [#allocation10]  }
 0x1b5   : > { %p1268_p9 = scmp.ne.s32.totalorder %s1645_s17, %s1267_s18  ;;  %s1271_s23 = sshll.u32 %s1401_s19, 4  ;;  %s1272_s23 = int_to_ptr.vmem [resolvable:$false] %s1271_s23 }
 0x1b6   : > { %s1273_s21 = scalar_lea.vmem %s1272_s23, 512  ;;  %p1274_p4 = scmp.lt.s32.totalorder %s1645_s17, %s1272_s23 }
 0x1b7   : > { %p1269_p13 = pnand %p1268_p9, %p1551_p5  ;;  %p1275_p6 = scmp.lt.s32.totalorder %s1273_s21, %s1267_s18 }
 0x1b9   : > { %p1270_p2 = pneg %p1269_p13  ;;  %p1276_p12 = por %p1275_p6, %p1274_p4 }
 0x1bb   : > { %p1277_p0 = pnand %p1276_p12, %p1270_p2 }
 0x1bd   : > { %1280 = shalt.err (!%p1277_p0)
}
 0x1be   : > { %s1281_s28 = scalar_lea.hbm %s1681_s25, 256  ;;  %s1285_s16 = scalar_lea.hbm %s1782_s7, 512 }
 0x1bf   : > { %p1282_p3 = scmp.ne.s32.totalorder %s1681_s25, %s1281_s28  ;;  %p1286_p8 = scmp.lt.s32.totalorder %s1681_s25, %s1782_s7 }
 0x1c0   : > { %p1287_p11 = scmp.lt.s32.totalorder %s1285_s16, %s1281_s28 }
 0x1c1   : > { %p1283_p10 = pnand %p1282_p3, %p1551_p5 }
 0x1c2   : > { %p1288_p1 = por %p1287_p11, %p1286_p8 }
 0x1c3   : > { %p1284_p7 = pneg %p1283_p10 }
 0x1c5   : > { %p1289_p9 = pnand %p1288_p1, %p1284_p7 }
 0x1c7   : > { %1292 = shalt.err (!%p1289_p9)
}
 0x1c8   : > { %1031 = dma.vmem_to_hbm [thread:$0]  (%p1551_p5), %s1645_s17, 256, %s1681_s25, %s690_s3, %s1399_s20, %s1399_s20, %s1400_s27   ;;  %v680_v37 = vpop.permute.xlu1 %679  ;;  %v675_v38 = vpop.permute.xlu0 %674 }
 0x1c9   : > { %s748_s18 = sshll.u32 %s1623_s26, 4  ;;  %965 = vst.msk [vmem:[%s1623_s26 + $0x8] sm:$0xf] %vm503_vm2, %v680_v37  ;;  %964 = vst.msk [vmem:[%s1623_s26 + $0x4] sm:$0xf] %vm503_vm2, %v675_v38  ;;  %s1722_s28 = scalar_lea.hbm %s1784_s9, %s1630_s5  ;;  %s1716_s18 = int_to_ptr.vmem [resolvable:$true] %s748_s18 }
 0x1ca   : > { %s1293_s17 = scalar_lea.vmem %s1716_s18, 256  ;;  %s1402_s25 = smov [#allocation13]  }
 0x1cb   : > { %p1294_p13 = scmp.ne.s32.totalorder %s1716_s18, %s1293_s17  ;;  %s1297_s3 = sshll.u32 %s1402_s25, 4  ;;  %s1298_s3 = int_to_ptr.vmem [resolvable:$false] %s1297_s3 }
 0x1cc   : > { %v685_v39 = vpop.permute.xlu0 %684  ;;  %s1299_s1 = scalar_lea.vmem %s1298_s3, 512  ;;  %p1300_p6 = scmp.lt.s32.totalorder %s1716_s18, %s1298_s3 }
 0x1cd   : > { %966 = vst.msk [vmem:[%s1623_s26 + $0xc] sm:$0xf] %vm503_vm2, %v685_v39  ;;  %p1295_p2 = pnand %p1294_p13, %p1551_p5  ;;  %p1301_p12 = scmp.lt.s32.totalorder %s1299_s1, %s1293_s17 }
 0x1cf   : > { %p1296_p4 = pneg %p1295_p2  ;;  %p1302_p0 = por %p1301_p12, %p1300_p6 }
 0x1d1   : > { %p1303_p3 = pnand %p1302_p0, %p1296_p4 }
 0x1d3   : > { %1306 = shalt.err (!%p1303_p3)
}
 0x1d4   : > { %s1307_s5 = scalar_lea.hbm %s1722_s28, 256  ;;  %s1311_s16 = scalar_lea.hbm %s1784_s9, 512 }
 0x1d5   : > { %p1308_p10 = scmp.ne.s32.totalorder %s1722_s28, %s1307_s5  ;;  %p1312_p11 = scmp.lt.s32.totalorder %s1722_s28, %s1784_s9 }
 0x1d6   : > { %p1313_p1 = scmp.lt.s32.totalorder %s1311_s16, %s1307_s5 }
 0x1d7   : > { %p1309_p7 = pnand %p1308_p10, %p1551_p5 }
 0x1d8   : > { %p1314_p9 = por %p1313_p1, %p1312_p11 }
 0x1d9   : > { %p1310_p8 = pneg %p1309_p7 }
 0x1db   : > { %p1315_p13 = pnand %p1314_p9, %p1310_p8 }
 0x1dd   : > { %1318 = shalt.err (!%p1315_p13)
}
 0x1de   : > { %1033 = dma.vmem_to_hbm [thread:$0]  (%p1551_p5), %s1716_s18, 256, %s1722_s28, %s1651_s12, %s1399_s20, %s1399_s20, %s1400_s27  }
 0x1df PF: > { %s1810_s23 = sld [smem:[#allocation19_spill]]  ;;  %s763_s21 = sand.u32 1, %s1365_s30  }
 0x1e0   : > { %p1812_p4 = scmp.ge.s32.totalorder %s1385_s14, 2  ;;  %s764_s17 = scalar_lea.sflag [#allocation4], %s763_s21 }
 0x1e5   : > { %p1811_p2 = scmp.ne.s32.totalorder %s1810_s23, 0 }
 0x1e7   : > { %p1052_p6 = pnand %p1812_p4, %p1811_p2 }
 0x1e9   : > { %p1053_p12 = pneg %p1052_p6 }
 0x1eb   : > { %1356 = dma.done.wait (%p1053_p12), %s764_s17, 256  }
 0x1ec   : > { %1358 = vsyncadd (%p1053_p12), %s764_s17, 4294967040  ;;  %s1813_s22 = sadd.s32 4294967294, %s1385_s14  }
 0x1ed   : > { %s772_s25 = sand.u32 1, %s1813_s22  }
 0x1ee   : > { %s773_s3 = scalar_lea.sflag [#allocation12], %s772_s25 }
 0x1ef   : > { %1360 = dma.done.wait (%p1053_p12), %s773_s3, 512  }
 0x1f0   : > { %1362 = vsyncadd (%p1053_p12), %s773_s3, 4294966784  ;;  %s31_s14 = sadd.s32 1, %s1385_s14   ;;  %s1814_s20 = sld [smem:[#allocation20_spill]] }
 0x1f1   : > { %p28_p5 = scmp.ge.s32.totalorder %s31_s14, 4   ;;  %s1815_s30 = smov %s1369_s10 }
 0x1f2   : > { %s1816_s10 = smov %s1373_s11  ;;  %s1817_s11 = smov %s1563_s29 }
 0x1f3   : > { %s1818_s12 = smov %s1381_s13  ;;  %30 = sbr.rel (!%p28_p5) target bundleno = 14 (0xe), region = 146 }
 0x1f6   : > { %s1819_s13 = smov %s1814_s20 }
 0x1f8   :  { %787 = vsyncpa [#allocation3], 1 }
 0x1f9   :  { %789 = vsyncpa [#allocation3 + $0x1], 1 }
 0x1fa   :  { %790 = vsyncpa [#allocation6], 1 }
 0x1fb   :  { %791 = vsyncpa [#allocation9], 1 }
 0x1fc   :  { %792 = vsyncpa [#allocation4], 1 }
 0x1fd   :  { %794 = vsyncpa [#allocation4 + $0x1], 1 }
 0x1fe   :  { %795 = vsyncpa [#allocation12], 1 }
 0x1ff   :  { %797 = vsyncpa [#allocation12 + $0x1], 1 }

</bundles_post_ra>
